<compile_context>
chip_gen: v6e
topology: v6e:2x2x1
jax: 0.10.0
libtpu: 0.0.40
codegen_flags: <defaults>
</compile_context>

<pallas_src>
import functools

import jax
import jax.numpy as jnp
from jax.experimental import pallas as pl
from jax.experimental.pallas import tpu as pltpu


_LANE = 128
_PALLAS_MIN_ELEMENTS = 1 << 16    # below this, elementwise ops bypass Pallas


def _round_up(x, m):
    return ((x + m - 1) // m) * m


def _sublane(dtype):
    # Minimal sublane pack per dtype: 8 rows (f32), 16 (bf16), 32 (int8/fp8).
    return max(8, 32 // jnp.dtype(dtype).itemsize)


def _vmem_limits():
    """Generation-aware VMEM budget (128 MiB on v5e/v6e, 64 MiB on v7x)."""
    cap = 64 * 1024 * 1024
    try:
        info = pltpu.get_tpu_info()
        cap = int(getattr(info, "vmem_capacity_bytes", cap)) or cap
    except Exception:
        pass
    limit = (cap * 3) // 4            # scoped-VMEM limit handed to Mosaic
    budget = int(limit * 0.85)        # what the tile-size chooser plans against
    return budget, limit


_VMEM_BUDGET, _VMEM_LIMIT = _vmem_limits()


def _compiler_params():
    return pltpu.CompilerParams(
        dimension_semantics=("parallel",),
        vmem_limit_bytes=_VMEM_LIMIT,
    )


def _choose_tile_rows(n_rows, io_bytes_per_row, temp_bytes_per_row,
                      resident_bytes, max_rows, sublane):
    """Pick a batch-row tile.

    Budget: double-buffered IO tiles + single in-kernel f32 temporaries +
    (double-buffered) resident weights must fit _VMEM_BUDGET.  The tile is also
    capped so the 1-D batch grid keeps >= 2 steps (lets v7x shard the batch
    across its 2 TensorCores) and rounded to the dtype's sublane pack
    (multiples of 256 once large, to fill the MXU M dimension).
    """
    avail = _VMEM_BUDGET - 2 * int(resident_bytes)
    per_row = 2 * int(io_bytes_per_row) + int(temp_bytes_per_row)
    rows = max(sublane, avail // max(per_row, 1))
    rows = min(rows, max_rows, _round_up(n_rows, sublane))
    if n_rows > 2 * sublane:
        rows = min(rows, _round_up(-(-n_rows // 2), sublane))
    if rows >= 512:
        rows = (rows // 256) * 256
    else:
        rows = max(sublane, (rows // sublane) * sublane)
    return int(rows)


# ------------------------------------------------------------------
# Pallas kernels
# ------------------------------------------------------------------
def _ew_kernel(op, x1_ref, x2_ref, o_ref):
    o_ref[...] = op(x1_ref[...], x2_ref[...]).astype(o_ref.dtype)


def _concat_kernel(x1_ref, x2_ref, w1_ref, w2_ref, b_ref, o_ref, *, cd):
    # relu(concat([X1, X2], -1) @ W + b) with the concat folded away:
    # two MXU dots against the split resident weight, f32 accumulate.
    y = jnp.dot(x1_ref[...].astype(cd), w1_ref[...],
                preferred_element_type=jnp.float32)
    y = y + jnp.dot(x2_ref[...].astype(cd), w2_ref[...],
                    preferred_element_type=jnp.float32)
    y = y + b_ref[...]                       # bias (1, H), f32 epilogue
    o_ref[...] = jnp.maximum(y, 0.0).astype(o_ref.dtype)


def _attention_kernel(x1_ref, x2_ref, wa_ref, ba_ref, wb_ref, o_ref, *, cd):
    # out = attention1(X1) * X1 + attention1(X2) * X2
    # NOTE: matches the reference PyTorch forward, which applies self.attention1
    # to BOTH inputs (attention2 is defined but never used).
    def att(x):
        h = jnp.dot(x.astype(cd), wa_ref[...], preferred_element_type=jnp.float32)
        h = jnp.maximum(h + ba_ref[...], 0.0)                 # f32 epilogue
        s = jnp.dot(h.astype(cd), wb_ref[...], preferred_element_type=jnp.float32)
        m = jnp.max(s, axis=-1, keepdims=True)
        e = jnp.exp(s - m)
        return e * pl.reciprocal(jnp.sum(e, axis=-1, keepdims=True), approx=True)

    x1 = x1_ref[...]
    x2 = x2_ref[...]
    out = att(x1) * x1.astype(jnp.float32) + att(x2) * x2.astype(jnp.float32)
    o_ref[...] = out.astype(o_ref.dtype)


# ------------------------------------------------------------------
# pallas_call wrappers
# ------------------------------------------------------------------
def _pallas_elementwise(op, x1, x2):
    b, h = x1.shape
    sublane = _sublane(x1.dtype)
    tile_b = _choose_tile_rows(
        b, io_bytes_per_row=3 * h * x1.dtype.itemsize,
        temp_bytes_per_row=0, resident_bytes=0,
        max_rows=4096, sublane=sublane)
    spec = pl.BlockSpec((tile_b, h), lambda i: (i, 0))
    return pl.pallas_call(
        functools.partial(_ew_kernel, op),
        out_shape=jax.ShapeDtypeStruct((b, h), x1.dtype),
        grid=(pl.cdiv(b, tile_b),),
        in_specs=[spec, spec],
        out_specs=spec,
        compiler_params=_compiler_params(),
    )(x1, x2)


def _run_batch_tiled(kernel, x1, x2, params, tile_b, out_dtype):
    b, h = x1.shape
    x_spec = pl.BlockSpec((tile_b, h), lambda i: (i, 0))
    # Weights/bias: full-array blocks with a constant index_map -> fetched once
    # and kept resident in VMEM (the pipeline skips re-DMA on repeated indices).
    # TODO(synk): mark these pipeline_mode=pl.Buffered(1) once single-buffered
    # resident blocks are universally supported; would halve their VMEM cost.
    param_specs = [pl.BlockSpec(p.shape, lambda i, nd=p.ndim: (0,) * nd)
                   for p in params]
    return pl.pallas_call(
        kernel,
        out_shape=jax.ShapeDtypeStruct((b, h), out_dtype),
        grid=(pl.cdiv(b, tile_b),),
        in_specs=[x_spec, x_spec] + param_specs,
        out_specs=x_spec,
        compiler_params=_compiler_params(),
    )(x1, x2, *params)


# ------------------------------------------------------------------
# BridgeModule (JAX / Pallas)
# ------------------------------------------------------------------
class BridgeModule:
    def __init__(self, hidden_dim, bridge_type="hadamard_product", key=None,
                 compute_dtype=jnp.bfloat16, force_pallas=False):
        assert bridge_type in [
            "hadamard_product",
            "pointwise_addition",
            "concatenation",
            "attention_pooling",
        ], f"bridge_type={bridge_type} is not supported."
        self.bridge_type = bridge_type
        self.hidden_dim = hidden_dim
        self.compute_dtype = compute_dtype      # MXU input dtype (bf16 everywhere)
        self.force_pallas = force_pallas
        if key is None:
            key = jax.random.PRNGKey(0)
        H, cd = hidden_dim, compute_dtype

        if bridge_type == "concatenation":
            k1, k2 = jax.random.split(key, 2)
            scale = (2.0 * hidden_dim) ** -0.5
            # torch Linear(2H, H): stored transposed, y = x @ W + b.
            w = jax.random.uniform(k1, (2 * H, H), jnp.float32, -scale, scale)
            bvec = jax.random.uniform(k2, (H,), jnp.float32, -scale, scale)
            self.w_f32, self.b_f32 = w, bvec
            # Split resident weights: y = X1 @ W_top + X2 @ W_bot (no in-kernel concat).
            self.w1 = w[:H].astype(cd)
            self.w2 = w[H:].astype(cd)
            self.b2d = bvec.reshape(1, H)
        elif bridge_type == "attention_pooling":
            k1, k2, k3 = jax.random.split(key, 3)
            scale = float(hidden_dim) ** -0.5
            # attention1: Linear(H,H)+ReLU, Linear(H,H,bias=False), Softmax(-1)
            wa = jax.random.uniform(k1, (H, H), jnp.float32, -scale, scale)
            ba = jax.random.uniform(k2, (H,), jnp.float32, -scale, scale)
            wb = jax.random.uniform(k3, (H, H), jnp.float32, -scale, scale)
            self.wa_f32, self.ba_f32, self.wb_f32 = wa, ba, wb
            self.wa = wa.astype(cd)
            self.ba2d = ba.reshape(1, H)
            self.wb = wb.astype(cd)
            # NOTE: attention2 exists in the torch module but its forward only
            # uses attention1 (for both inputs); omitted here.
        # TODO(synk): for hidden_dim large enough that resident bf16 weights
        # approach the VMEM budget, add a K-reduction grid axis with a VMEM f32
        # accumulator (pl.when init/finalize, reduction axis last, "arbitrary").

    def __call__(self, x1, x2):
        b, h = x1.shape
        assert h == self.hidden_dim

        if self.bridge_type in ("hadamard_product", "pointwise_addition"):
            op = jnp.multiply if self.bridge_type == "hadamard_product" else jnp.add
            # A standalone binary elementwise Pallas call can't beat an XLA op
            # that fuses into its neighbours; take the Pallas path only when
            # forced or when the shape is large and lane-dense.
            if self.force_pallas or (x1.size >= _PALLAS_MIN_ELEMENTS
                                     and h % _LANE == 0):
                return _pallas_elementwise(op, x1, x2)
            return op(x1, x2)

        sublane = _sublane(x1.dtype)
        if self.bridge_type == "concatenation":
            params = (self.w1, self.w2, self.b2d)
            kernel = functools.partial(_concat_kernel, cd=self.compute_dtype)
            temp_per_row = 8 * h * 4          # bf16 casts + f32 accum/relu
        else:  # attention_pooling
            params = (self.wa, self.ba2d, self.wb)
            kernel = functools.partial(_attention_kernel, cd=self.compute_dtype)
            temp_per_row = 14 * h * 4         # two att() chains of f32 temporaries

        resident = sum(int(p.size) * p.dtype.itemsize for p in params)
        tile_b = _choose_tile_rows(
            b, io_bytes_per_row=3 * h * x1.dtype.itemsize,
            temp_bytes_per_row=temp_per_row, resident_bytes=resident,
            max_rows=1024, sublane=sublane)
        return _run_batch_tiled(kernel, x1, x2, params, tile_b, x1.dtype)


# ------------------------------------------------------------------
# Pure-JAX references (mirror the kernels' compute_dtype cast on MXU inputs so
# the check is tight).
# ------------------------------------------------------------------
def _ref_forward(mod: BridgeModule, x1, x2):
    cd = mod.compute_dtype
    if mod.bridge_type == "hadamard_product":
        return x1 * x2
    if mod.bridge_type == "pointwise_addition":
        return x1 + x2
    if mod.bridge_type == "concatenation":
        x = jnp.concatenate([x1, x2], axis=-1)
        y = jnp.dot(x.astype(cd), mod.w_f32.astype(cd),
                    preferred_element_type=jnp.float32) + mod.b_f32
        return jnp.maximum(y, 0.0)
    if mod.bridge_type == "attention_pooling":
        def att(x):
            pre = jnp.dot(x.astype(cd), mod.wa_f32.astype(cd),
                          preferred_element_type=jnp.float32) + mod.ba_f32
            hid = jnp.maximum(pre, 0.0)
            s = jnp.dot(hid.astype(cd), mod.wb_f32.astype(cd),
                        preferred_element_type=jnp.float32)
            return jax.nn.softmax(s, axis=-1)
        return att(x1) * x1 + att(x2) * x2


if __name__ == "__main__":
    key = jax.random.PRNGKey(0)
    kx1, kx2, kp = jax.random.split(key, 3)

    variants = [
        "hadamard_product",
        "pointwise_addition",
        "concatenation",
        "attention_pooling",
    ]
    ok = True

    # Small-shape check (force the Pallas path so the kernels are exercised).
    batch, hidden_dim = 16, 32
    x1 = jax.random.normal(kx1, (batch, hidden_dim), jnp.float32)
    x2 = jax.random.normal(kx2, (batch, hidden_dim), jnp.float32)
    for bridge_type in variants:
        mod = BridgeModule(hidden_dim, bridge_type=bridge_type, key=kp,
                           force_pallas=True)
        out = jax.block_until_ready(mod(x1, x2))
        ref = _ref_forward(mod, x1, x2)
        if out.shape != ref.shape or not bool(
                jnp.allclose(out, ref, atol=5e-3, rtol=5e-3)):
            ok = False
            print(f"MISMATCH in bridge_type={bridge_type}")

    # Non-divisible batch & hidden dims: multi-step grid with a partial final
    # block (overhang rows masked on store), no wrapper padding/slicing.
    kx3, kx4 = jax.random.split(kx1)
    bb, hh = 1000, 72
    y1 = jax.random.normal(kx3, (bb, hh), jnp.float32)
    y2 = jax.random.normal(kx4, (bb, hh), jnp.float32)
    for bridge_type in variants:
        mod = BridgeModule(hh, bridge_type=bridge_type, key=kp, force_pallas=True)
        out = jax.block_until_ready(mod(y1, y2))
        ref = _ref_forward(mod, y1, y2)
        if out.shape != ref.shape or not bool(
                jnp.allclose(out, ref, atol=5e-3, rtol=5e-3)):
            ok = False
            print(f"MISMATCH (large) in bridge_type={bridge_type}")

    if ok:
        print("KERNEL_OK")
</pallas_src>

<mosaic_0001>
module attributes {stable_mosaic.version = 11 : i64} {
  func.func @_ew_kernel(%arg0: i32, %arg1: memref<16x32xf32, #tpu.memory_space<vmem>>, %arg2: memref<16x32xf32, #tpu.memory_space<vmem>>, %arg3: memref<16x32xf32, #tpu.memory_space<vmem>>) attributes {dimension_semantics = [#tpu.dimension_semantics<parallel>], iteration_bounds = array<i64: 1>, scalar_prefetch = 0 : i64, scratch_operands = 0 : i64, tpu.core_type = #tpu.core_type<tc>, window_params = [{transform_indices = @transform_0, window_bounds = array<i64: 16, 32>}, {transform_indices = @transform_1, window_bounds = array<i64: 16, 32>}, {transform_indices = @transform_2, window_bounds = array<i64: 16, 32>}]} {
    %c0 = arith.constant 0 : index
    %c0_0 = arith.constant 0 : index
    %0 = vector.load %arg1[%c0, %c0_0] : memref<16x32xf32, #tpu.memory_space<vmem>>, vector<16x32xf32>
    %c0_1 = arith.constant 0 : index
    %c0_2 = arith.constant 0 : index
    %1 = vector.load %arg2[%c0_1, %c0_2] : memref<16x32xf32, #tpu.memory_space<vmem>>, vector<16x32xf32>
    %2 = arith.mulf %0, %1 : vector<16x32xf32>
    %c0_3 = arith.constant 0 : index
    %c0_4 = arith.constant 0 : index
    %3 = vector.load %arg3[%c0_3, %c0_4] : memref<16x32xf32, #tpu.memory_space<vmem>>, vector<16x32xf32>
    tpu.vector_store %arg3[%c0_3, %c0_4], %2 {strides = array<i32>} : memref<16x32xf32, #tpu.memory_space<vmem>>, vector<16x32xf32>,
    return
  }
  func.func @transform_0(%arg0: i32) -> (i32, i32) {
    %c0_i32 = arith.constant 0 : i32
    %c0_i32_0 = arith.constant 0 : i32
    return %arg0, %c0_i32 : i32, i32
  }
  func.func @transform_1(%arg0: i32) -> (i32, i32) {
    %c0_i32 = arith.constant 0 : i32
    %c0_i32_0 = arith.constant 0 : i32
    return %arg0, %c0_i32 : i32, i32
  }
  func.func @transform_2(%arg0: i32) -> (i32, i32) {
    %c0_i32 = arith.constant 0 : i32
    %c0_i32_0 = arith.constant 0 : i32
    return %arg0, %c0_i32 : i32, i32
  }
}

</mosaic_0001>

<bundles_post_ra>
// kernel: tpu_custom_call.1
= control target key start
LH: loop header
LB: loop body
LE: loop exit
PB: predicated region body
PF: predicated region fallthrough
CT: control target
= control target key end

     0   :  { %7 = vsyncpa [#allocation3], 0  ;;  %s176_s0 = inlined_call_operand.hbm [shape: f32[16,32], index: 0, kind: input, shape index: {}]   ;;  %s177_s1 = inlined_call_operand.hbm [shape: f32[16,32], index: 1, kind: input, shape index: {}]   ;;  %s178_s2 = inlined_call_operand.hbm [shape: f32[16,32], index: 2, kind: output, shape index: {}]  }
   0x1   :  { %8 = vsyncpa [#allocation6], 0 }
   0x2   :  { %9 = vsyncpa [#allocation4], 0  ;;  %s138_s9 = smov [#allocation2]  }
   0x3   :  { %s15_s10 = sshll.u32 %s138_s9, 4  ;;  %s16_s10 = int_to_ptr.vmem [resolvable:$true] %s15_s10 }
   0x4   :  { %s80_s11 = scalar_lea.vmem %s16_s10, 256  ;;  %p85_p1 = scmp.lt.s32.totalorder %s16_s10, %s16_s10 }
   0x5   :  { %p81_p0 = scmp.ne.s32.totalorder %s16_s10, %s80_s11  ;;  %p86_p2 = scmp.lt.s32.totalorder %s80_s11, %s80_s11 }
   0x7   :  { %p87_p3 = por %p86_p2, %p85_p1 }
   0x9   :  { %p88_p4 = pnand %p87_p3, %p81_p0 }
   0xb   :  { %91 = shalt.err (!%p88_p4)
}
   0xc   :  { %s139_s12 = smov 128   ;;  %s140_s13 = smov 8  }
   0xd   :  { %21 = dma.hbm_to_vmem [thread:$0]  %s176_s0, 256, %s16_s10, [#allocation3], %s139_s12, %s139_s12, %s140_s13  }
   0xe   :  { %s141_s16 = smov [#allocation5]  }
   0xf   :  { %s27_s17 = sshll.u32 %s141_s16, 4  ;;  %s28_s17 = int_to_ptr.vmem [resolvable:$true] %s27_s17 }
  0x10   :  { %s100_s18 = scalar_lea.vmem %s28_s17, 256  ;;  %p105_p6 = scmp.lt.s32.totalorder %s28_s17, %s28_s17 }
  0x11   :  { %p101_p5 = scmp.ne.s32.totalorder %s28_s17, %s100_s18  ;;  %p106_p7 = scmp.lt.s32.totalorder %s100_s18, %s100_s18 }
  0x13   :  { %p107_p8 = por %p106_p7, %p105_p6 }
  0x15   :  { %p108_p9 = pnand %p107_p8, %p101_p5 }
  0x17   :  { %111 = shalt.err (!%p108_p9)
}
  0x18   :  { %33 = dma.hbm_to_vmem [thread:$0]  %s177_s1, 256, %s28_s17, [#allocation6], %s139_s12, %s139_s12, %s140_s13  }
  0x19   :  { %132 = dma.done.wait [#allocation3], 256  }
  0x1a   :  { %133 = vsyncadd [#allocation3], 4294967040 }
  0x1b   :  { %134 = dma.done.wait [#allocation6], 256  }
  0x1c   :  { %135 = vsyncadd [#allocation6], 4294967040  ;;  %s142_s0 = smov [#allocation7]   ;;  %v40_v0 = vld [vmem:[#allocation2] sm:$0xff]  ;;  %v42_v1 = vld [vmem:[#allocation5] sm:$0xff]  ;;  %vm46_vm0 = vcmask 261120  }
  0x1d   :  { %s54_s21 = sshll.u32 %s142_s0, 4  ;;  %v41_v2 = vld [vmem:[#allocation2 + $0x8] sm:$0xff]  ;;  %v44_v3 = vmul.f32 %v42_v1, %v40_v0  ;;  %v43_v4 = vld [vmem:[#allocation5 + $0x8] sm:$0xff]  ;;  %s55_s21 = int_to_ptr.vmem [resolvable:$true] %s54_s21 }
  0x1e   :  { %v45_v5 = vmul.f32 %v43_v4, %v41_v2  ;;  %s112_s22 = scalar_lea.vmem %s55_s21, 256  ;;  %p117_p11 = scmp.lt.s32.totalorder %s55_s21, %s55_s21 }
  0x1f   :  { %47 = vst.msk [vmem:[#allocation7] sm:$0xff] %vm46_vm0, %v44_v3  ;;  %p113_p10 = scmp.ne.s32.totalorder %s55_s21, %s112_s22  ;;  %p118_p12 = scmp.lt.s32.totalorder %s112_s22, %s112_s22 }
  0x20   :  { %48 = vst.msk [vmem:[#allocation7 + $0x8] sm:$0xff] %vm46_vm0, %v45_v5 }
  0x21   :  { %p119_p13 = por %p118_p12, %p117_p11 }
  0x23   :  { %p120_p0 = pnand %p119_p13, %p113_p10 }
  0x25   :  { %123 = shalt.err (!%p120_p0)
}
  0x26   :  { %60 = dma.vmem_to_hbm [thread:$0]  %s55_s21, 256, %s178_s2, [#allocation4], %s139_s12, %s139_s12, %s140_s13  }
  0x27   :  { %136 = dma.done.wait [#allocation4], 256  }
  0x28   :  { %137 = vsyncadd [#allocation4], 4294967040 }
  0x29   :  { %64 = vsyncpa [#allocation3], 1 }
  0x2a   :  { %65 = vsyncpa [#allocation6], 1 }
  0x2b   :  { %66 = vsyncpa [#allocation4], 1 }

</bundles_post_ra>
